<compile_context>
chip_gen: v7x
topology: tpu7x:2x2x1
jax: 0.10.0
libtpu: 0.0.40
codegen_flags: <defaults>
</compile_context>

<pallas_src>
import jax
import jax.numpy as jnp
from jax.experimental import pallas as pl
from jax.experimental.pallas import tpu as pltpu

_LANE = 128
_MIN_TILE = 16      # bf16 sublane packing
_MAX_TILE = 2048    # batch-tile cap (still tiny VMEM at these widths)


def _cdiv(a, b):
    return -(-a // b)


def _round_up(x, m):
    return _cdiv(x, m) * m


def _leaky_relu(x, negative_slope=0.2):
    # max(x, 0.2*x) == LeakyReLU(0.2) since slope < 1; one VPU op fewer than where().
    return jnp.maximum(x, negative_slope * x)


def _sigmoid(x):
    # tanh-based sigmoid: one EUP transcendental, no divide.
    return 0.5 * (jnp.tanh(0.5 * x) + 1.0)


def ranknet_kernel(x_ref, w1_ref, b1_ref, w2_ref, b2_ref, w3_ref, b3_ref,
                   w4_ref, b4_ref, out_ref):
    two, tb, d_in = x_ref.shape
    # x1 rows followed by x2 rows (delivered adjacent by the stacked BlockSpec):
    # the 4-layer MLP runs ONCE per grid step (4 MXU matmuls instead of 8).
    x = x_ref[...].reshape(two * tb, d_in)

    def dense(h, w_ref, b_ref):
        return jnp.dot(h, w_ref[...], preferred_element_type=jnp.float32) + b_ref[...]

    h = _leaky_relu(dense(x, w1_ref, b1_ref)).astype(jnp.bfloat16)
    h = _leaky_relu(dense(h, w2_ref, b2_ref)).astype(jnp.bfloat16)
    h = _leaky_relu(dense(h, w3_ref, b3_ref)).astype(jnp.bfloat16)
    r = _sigmoid(dense(h, w4_ref, b4_ref))          # f32, (2*tb, outputs)

    out_ref[...] = _sigmoid(r[:tb, :] - r[tb:, :])


def _pad_cast(a, shape, dtype):
    if tuple(a.shape) != tuple(shape):
        a = jnp.pad(a, [(0, s - d) for d, s in zip(a.shape, shape)])
    return a.astype(dtype)


def _ranknet_forward_impl(x1, x2, params):
    """params: w1..w4 of shape (in, out) (pre-transposed), b1..b4 of shape (1, out)."""
    batch, inputs = x1.shape
    hidden = params["w1"].shape[1]
    outputs = params["w4"].shape[1]

    # Hidden dim padded to a lane multiple (zero pads are inert through
    # leaky-ReLU): lane-dense activations, aligned MXU N/K. Inputs/outputs are
    # NOT padded (would only inflate HBM traffic).
    hidden_pad = _round_up(hidden, _LANE)

    # Batch tiling: multiples of 16, minimal tail padding, and >=2 grid steps
    # when the batch allows it (v7x has 2 TensorCores under "parallel").
    n_tiles = _cdiv(batch, _MAX_TILE)
    if n_tiles == 1 and batch >= 2 * _MIN_TILE:
        n_tiles = 2
    block_b = _round_up(_cdiv(batch, n_tiles), _MIN_TILE)
    batch_pad = _round_up(batch, block_b)
    grid = (batch_pad // block_b,)

    # Stack x1/x2 -> (2, batch_pad, inputs) bf16 (cast+pad+stack fuse in XLA).
    x12 = jnp.stack([x1, x2], axis=0).astype(jnp.bfloat16)
    if batch_pad != batch:
        x12 = jnp.pad(x12, ((0, 0), (0, batch_pad - batch), (0, 0)))

    # bf16 MXU operands; f32 accumulation / bias / activation math in-kernel.
    w1 = _pad_cast(params["w1"], (inputs, hidden_pad), jnp.bfloat16)
    w2 = _pad_cast(params["w2"], (hidden_pad, hidden_pad), jnp.bfloat16)
    w3 = _pad_cast(params["w3"], (hidden_pad, hidden_pad), jnp.bfloat16)
    w4 = _pad_cast(params["w4"], (hidden_pad, outputs), jnp.bfloat16)
    b1 = _pad_cast(params["b1"], (1, hidden_pad), jnp.float32)
    b2 = _pad_cast(params["b2"], (1, hidden_pad), jnp.float32)
    b3 = _pad_cast(params["b3"], (1, hidden_pad), jnp.float32)
    b4 = params["b4"].astype(jnp.float32)

    def batch_map(i):
        return (0, i, 0)

    def out_map(i):
        return (i, 0)

    def const_map(i):
        return (0, 0)

    def resident(arr):
        # Constant index_map => block never changes; single-buffer to halve
        # its VMEM footprint (matters on v7x's 64 MiB VMEM as hidden grows).
        return pl.BlockSpec(arr.shape, const_map, pipeline_mode=pl.Buffered(1))

    in_specs = [
        pl.BlockSpec((2, block_b, inputs), batch_map),   # stacked x1/x2 tile
        resident(w1), resident(b1),
        resident(w2), resident(b2),
        resident(w3), resident(b3),
        resident(w4), resident(b4),
    ]
    out_spec = pl.BlockSpec((block_b, outputs), out_map)

    # Advisory cost hint for XLA scheduling around this custom call.
    flops = 2 * (2 * batch_pad) * (
        inputs * hidden_pad + 2 * hidden_pad * hidden_pad + hidden_pad * outputs)
    transcendentals = 3 * batch_pad * outputs
    bytes_accessed = (
        x12.size * 2                                    # bf16 inputs
        + batch_pad * outputs * 4                       # f32 output
        + (w1.size + w2.size + w3.size + w4.size) * 2   # bf16 weights
        + (b1.size + b2.size + b3.size + b4.size) * 4   # f32 biases
    )

    out = pl.pallas_call(
        ranknet_kernel,
        out_shape=jax.ShapeDtypeStruct((batch_pad, outputs), jnp.float32),
        grid=grid,
        in_specs=in_specs,
        out_specs=out_spec,
        compiler_params=pltpu.CompilerParams(
            dimension_semantics=("parallel",),
        ),
        cost_estimate=pl.CostEstimate(
            flops=flops,
            transcendentals=transcendentals,
            bytes_accessed=bytes_accessed,
        ),
    )(x12, w1, b1, w2, b2, w3, b3, w4, b4)

    if batch_pad != batch:
        out = out[:batch]
    return out


ranknet_forward = jax.jit(_ranknet_forward_impl)


def init_params(key, inputs, hidden_size, outputs):
    """PyTorch-nn.Linear-style init (uniform +-1/sqrt(fan_in)); weights stored (in, out)."""
    dims = [(inputs, hidden_size), (hidden_size, hidden_size),
            (hidden_size, hidden_size), (hidden_size, outputs)]
    params = {}
    for i, (fan_in, fan_out) in enumerate(dims, start=1):
        key, kw, kb = jax.random.split(key, 3)
        bound = 1.0 / (fan_in ** 0.5)
        params[f"w{i}"] = jax.random.uniform(
            kw, (fan_in, fan_out), jnp.float32, minval=-bound, maxval=bound)
        params[f"b{i}"] = jax.random.uniform(
            kb, (1, fan_out), jnp.float32, minval=-bound, maxval=bound)
    return params


def _matched_reference(x1, x2, params):
    """Same bf16-operand / f32-accumulate arithmetic as the kernel (tight check)."""
    def mlp(x):
        h = x.astype(jnp.bfloat16)
        for i in range(1, 5):
            w = params[f"w{i}"].astype(jnp.bfloat16)
            b = params[f"b{i}"]
            h = jnp.dot(h, w, preferred_element_type=jnp.float32) + b
            if i < 4:
                h = jnp.maximum(h, 0.2 * h).astype(jnp.bfloat16)
            else:
                h = _sigmoid(h)
        return h
    return _sigmoid(mlp(x1) - mlp(x2))


def _f32_reference(x1, x2, params):
    """Full-precision reference of the PyTorch module (loose check)."""
    def mlp(x):
        h = x @ params["w1"] + params["b1"]
        h = jnp.where(h >= 0, h, 0.2 * h)
        h = h @ params["w2"] + params["b2"]
        h = jnp.where(h >= 0, h, 0.2 * h)
        h = h @ params["w3"] + params["b3"]
        h = jnp.where(h >= 0, h, 0.2 * h)
        h = h @ params["w4"] + params["b4"]
        return jax.nn.sigmoid(h)
    return jax.nn.sigmoid(mlp(x1) - mlp(x2))


if __name__ == "__main__":
    batch, inputs, hidden_size, outputs = 8, 16, 32, 4

    key = jax.random.PRNGKey(0)
    key, k1, k2 = jax.random.split(key, 3)
    x1 = jax.random.normal(k1, (batch, inputs), jnp.float32)
    x2 = jax.random.normal(k2, (batch, inputs), jnp.float32)

    params = init_params(key, inputs, hidden_size, outputs)

    pred = ranknet_forward(x1, x2, params)
    pred = jax.block_until_ready(pred)
    assert pred.shape == (batch, outputs)

    # Tight check against a precision-matched reference (bf16 operands, f32 accum).
    ref_bf16 = _matched_reference(x1, x2, params)
    assert jnp.allclose(pred, ref_bf16, atol=1e-4, rtol=1e-4), "mismatch vs bf16-matched reference"

    # Loose check against the exact f32 PyTorch-equivalent forward.
    ref_f32 = _f32_reference(x1, x2, params)
    assert jnp.allclose(pred, ref_f32, atol=3e-2, rtol=3e-2), "mismatch vs f32 reference"

    print("KERNEL_OK")
</pallas_src>

<mosaic_0001>
module attributes {stable_mosaic.version = 11 : i64} {
  func.func @ranknet_kernel(%arg0: i32, %arg1: memref<2x16x16xbf16, #tpu.memory_space<vmem>>, %arg2: memref<16x128xbf16, #tpu.memory_space<vmem>>, %arg3: memref<1x128xf32, #tpu.memory_space<vmem>>, %arg4: memref<128x128xbf16, #tpu.memory_space<vmem>>, %arg5: memref<1x128xf32, #tpu.memory_space<vmem>>, %arg6: memref<128x128xbf16, #tpu.memory_space<vmem>>, %arg7: memref<1x128xf32, #tpu.memory_space<vmem>>, %arg8: memref<128x4xbf16, #tpu.memory_space<vmem>>, %arg9: memref<1x4xf32, #tpu.memory_space<vmem>>, %arg10: memref<16x4xf32, #tpu.memory_space<vmem>>) attributes {dimension_semantics = [#tpu.dimension_semantics<parallel>], iteration_bounds = array<i64: 1>, scalar_prefetch = 0 : i64, scratch_operands = 0 : i64, tpu.core_type = #tpu.core_type<tc>, window_params = [{transform_indices = @transform_0, window_bounds = array<i64: 2, 16, 16>}, {pipeline_mode = #tpu.pipeline_mode<synchronous>, transform_indices = @transform_1, window_bounds = array<i64: 16, 128>}, {pipeline_mode = #tpu.pipeline_mode<synchronous>, transform_indices = @transform_2, window_bounds = array<i64: 1, 128>}, {pipeline_mode = #tpu.pipeline_mode<synchronous>, transform_indices = @transform_3, window_bounds = array<i64: 128, 128>}, {pipeline_mode = #tpu.pipeline_mode<synchronous>, transform_indices = @transform_4, window_bounds = array<i64: 1, 128>}, {pipeline_mode = #tpu.pipeline_mode<synchronous>, transform_indices = @transform_5, window_bounds = array<i64: 128, 128>}, {pipeline_mode = #tpu.pipeline_mode<synchronous>, transform_indices = @transform_6, window_bounds = array<i64: 1, 128>}, {pipeline_mode = #tpu.pipeline_mode<synchronous>, transform_indices = @transform_7, window_bounds = array<i64: 128, 4>}, {pipeline_mode = #tpu.pipeline_mode<synchronous>, transform_indices = @transform_8, window_bounds = array<i64: 1, 4>}, {transform_indices = @transform_9, window_bounds = array<i64: 16, 4>}]} {
    %c0 = arith.constant 0 : index
    %c0_0 = arith.constant 0 : index
    %c0_1 = arith.constant 0 : index
    %0 = vector.load %arg1[%c0, %c0_0, %c0_1] : memref<2x16x16xbf16, #tpu.memory_space<vmem>>, vector<2x16x16xbf16>
    %1 = vector.shape_cast %0 : vector<2x16x16xbf16> to vector<32x16xbf16>
    %c0_2 = arith.constant 0 : index
    %c0_3 = arith.constant 0 : index
    %2 = vector.load %arg2[%c0_2, %c0_3] : memref<16x128xbf16, #tpu.memory_space<vmem>>, vector<16x128xbf16>
    %cst = arith.constant dense<0.000000e+00> : vector<32x128xf32>
    %3 = tpu.matmul %1, %2, %cst {dimension_numbers = #tpu.dot_dimension_numbers<[1], [0], [0], [1], [0, 0, 1, 1], [], []>} : vector<32x16xbf16>, vector<16x128xbf16>, vector<32x128xf32> -> vector<32x128xf32>
    %c0_4 = arith.constant 0 : index
    %c0_5 = arith.constant 0 : index
    %4 = vector.load %arg3[%c0_4, %c0_5] : memref<1x128xf32, #tpu.memory_space<vmem>>, vector<1x128xf32>
    %5 = vector.broadcast %4 : vector<1x128xf32> to vector<32x128xf32>
    %6 = arith.addf %3, %5 : vector<32x128xf32>
    %cst_6 = arith.constant 2.000000e-01 : f32
    %7 = vector.broadcast %cst_6 : f32 to vector<32x128xf32>
    %8 = arith.mulf %7, %6 : vector<32x128xf32>
    %9 = arith.maximumf %6, %8 : vector<32x128xf32>
    %10 = arith.truncf %9 : vector<32x128xf32> to vector<32x128xbf16>
    %c0_7 = arith.constant 0 : index
    %c0_8 = arith.constant 0 : index
    %11 = vector.load %arg4[%c0_7, %c0_8] : memref<128x128xbf16, #tpu.memory_space<vmem>>, vector<128x128xbf16>
    %cst_9 = arith.constant dense<0.000000e+00> : vector<32x128xf32>
    %12 = tpu.matmul %10, %11, %cst_9 {dimension_numbers = #tpu.dot_dimension_numbers<[1], [0], [0], [1], [0, 0, 1, 1], [], []>} : vector<32x128xbf16>, vector<128x128xbf16>, vector<32x128xf32> -> vector<32x128xf32>
    %c0_10 = arith.constant 0 : index
    %c0_11 = arith.constant 0 : index
    %13 = vector.load %arg5[%c0_10, %c0_11] : memref<1x128xf32, #tpu.memory_space<vmem>>, vector<1x128xf32>
    %14 = vector.broadcast %13 : vector<1x128xf32> to vector<32x128xf32>
    %15 = arith.addf %12, %14 : vector<32x128xf32>
    %cst_12 = arith.constant 2.000000e-01 : f32
    %16 = vector.broadcast %cst_12 : f32 to vector<32x128xf32>
    %17 = arith.mulf %16, %15 : vector<32x128xf32>
    %18 = arith.maximumf %15, %17 : vector<32x128xf32>
    %19 = arith.truncf %18 : vector<32x128xf32> to vector<32x128xbf16>
    %c0_13 = arith.constant 0 : index
    %c0_14 = arith.constant 0 : index
    %20 = vector.load %arg6[%c0_13, %c0_14] : memref<128x128xbf16, #tpu.memory_space<vmem>>, vector<128x128xbf16>
    %cst_15 = arith.constant dense<0.000000e+00> : vector<32x128xf32>
    %21 = tpu.matmul %19, %20, %cst_15 {dimension_numbers = #tpu.dot_dimension_numbers<[1], [0], [0], [1], [0, 0, 1, 1], [], []>} : vector<32x128xbf16>, vector<128x128xbf16>, vector<32x128xf32> -> vector<32x128xf32>
    %c0_16 = arith.constant 0 : index
    %c0_17 = arith.constant 0 : index
    %22 = vector.load %arg7[%c0_16, %c0_17] : memref<1x128xf32, #tpu.memory_space<vmem>>, vector<1x128xf32>
    %23 = vector.broadcast %22 : vector<1x128xf32> to vector<32x128xf32>
    %24 = arith.addf %21, %23 : vector<32x128xf32>
    %cst_18 = arith.constant 2.000000e-01 : f32
    %25 = vector.broadcast %cst_18 : f32 to vector<32x128xf32>
    %26 = arith.mulf %25, %24 : vector<32x128xf32>
    %27 = arith.maximumf %24, %26 : vector<32x128xf32>
    %28 = arith.truncf %27 : vector<32x128xf32> to vector<32x128xbf16>
    %c0_19 = arith.constant 0 : index
    %c0_20 = arith.constant 0 : index
    %29 = vector.load %arg8[%c0_19, %c0_20] : memref<128x4xbf16, #tpu.memory_space<vmem>>, vector<128x4xbf16>
    %cst_21 = arith.constant dense<0.000000e+00> : vector<32x4xf32>
    %30 = tpu.matmul %28, %29, %cst_21 {dimension_numbers = #tpu.dot_dimension_numbers<[1], [0], [0], [1], [0, 0, 1, 1], [], []>} : vector<32x128xbf16>, vector<128x4xbf16>, vector<32x4xf32> -> vector<32x4xf32>
    %c0_22 = arith.constant 0 : index
    %c0_23 = arith.constant 0 : index
    %31 = vector.load %arg9[%c0_22, %c0_23] : memref<1x4xf32, #tpu.memory_space<vmem>>, vector<1x4xf32>
    %32 = vector.broadcast %31 : vector<1x4xf32> to vector<32x4xf32>
    %33 = arith.addf %30, %32 : vector<32x4xf32>
    %cst_24 = arith.constant 5.000000e-01 : f32
    %34 = vector.broadcast %cst_24 : f32 to vector<32x4xf32>
    %35 = arith.mulf %34, %33 : vector<32x4xf32>
    %36 = math.tanh %35 : vector<32x4xf32>
    %cst_25 = arith.constant 1.000000e+00 : f32
    %37 = vector.broadcast %cst_25 : f32 to vector<32x4xf32>
    %38 = arith.addf %36, %37 : vector<32x4xf32>
    %cst_26 = arith.constant 5.000000e-01 : f32
    %39 = vector.broadcast %cst_26 : f32 to vector<32x4xf32>
    %40 = arith.mulf %39, %38 : vector<32x4xf32>
    %41 = vector.extract_strided_slice %40 {offsets = [0, 0], sizes = [16, 4], strides = [1, 1]} : vector<32x4xf32> to vector<16x4xf32>
    %42 = vector.extract_strided_slice %40 {offsets = [16, 0], sizes = [16, 4], strides = [1, 1]} : vector<32x4xf32> to vector<16x4xf32>
    %43 = arith.subf %41, %42 : vector<16x4xf32>
    %cst_27 = arith.constant 5.000000e-01 : f32
    %44 = vector.broadcast %cst_27 : f32 to vector<16x4xf32>
    %45 = arith.mulf %44, %43 : vector<16x4xf32>
    %46 = math.tanh %45 : vector<16x4xf32>
    %cst_28 = arith.constant 1.000000e+00 : f32
    %47 = vector.broadcast %cst_28 : f32 to vector<16x4xf32>
    %48 = arith.addf %46, %47 : vector<16x4xf32>
    %cst_29 = arith.constant 5.000000e-01 : f32
    %49 = vector.broadcast %cst_29 : f32 to vector<16x4xf32>
    %50 = arith.mulf %49, %48 : vector<16x4xf32>
    %c0_30 = arith.constant 0 : index
    %c0_31 = arith.constant 0 : index
    %51 = vector.load %arg10[%c0_30, %c0_31] : memref<16x4xf32, #tpu.memory_space<vmem>>, vector<16x4xf32>
    tpu.vector_store %arg10[%c0_30, %c0_31], %50 {strides = array<i32>} : memref<16x4xf32, #tpu.memory_space<vmem>>, vector<16x4xf32>,
    return
  }
  func.func @transform_0(%arg0: i32) -> (i32, i32, i32) {
    %c0_i32 = arith.constant 0 : i32
    %c0_i32_0 = arith.constant 0 : i32
    %c0_i32_1 = arith.constant 0 : i32
    return %c0_i32, %arg0, %c0_i32_0 : i32, i32, i32
  }
  func.func @transform_1(%arg0: i32) -> (i32, i32) {
    %c0_i32 = arith.constant 0 : i32
    %c0_i32_0 = arith.constant 0 : i32
    %c0_i32_1 = arith.constant 0 : i32
    return %c0_i32, %c0_i32_0 : i32, i32
  }
  func.func @transform_2(%arg0: i32) -> (i32, i32) {
    %c0_i32 = arith.constant 0 : i32
    %c0_i32_0 = arith.constant 0 : i32
    %c0_i32_1 = arith.constant 0 : i32
    return %c0_i32, %c0_i32_0 : i32, i32
  }
  func.func @transform_3(%arg0: i32) -> (i32, i32) {
    %c0_i32 = arith.constant 0 : i32
    %c0_i32_0 = arith.constant 0 : i32
    %c0_i32_1 = arith.constant 0 : i32
    return %c0_i32, %c0_i32_0 : i32, i32
  }
  func.func @transform_4(%arg0: i32) -> (i32, i32) {
    %c0_i32 = arith.constant 0 : i32
    %c0_i32_0 = arith.constant 0 : i32
    %c0_i32_1 = arith.constant 0 : i32
    return %c0_i32, %c0_i32_0 : i32, i32
  }
  func.func @transform_5(%arg0: i32) -> (i32, i32) {
    %c0_i32 = arith.constant 0 : i32
    %c0_i32_0 = arith.constant 0 : i32
    %c0_i32_1 = arith.constant 0 : i32
    return %c0_i32, %c0_i32_0 : i32, i32
  }
  func.func @transform_6(%arg0: i32) -> (i32, i32) {
    %c0_i32 = arith.constant 0 : i32
    %c0_i32_0 = arith.constant 0 : i32
    %c0_i32_1 = arith.constant 0 : i32
    return %c0_i32, %c0_i32_0 : i32, i32
  }
  func.func @transform_7(%arg0: i32) -> (i32, i32) {
    %c0_i32 = arith.constant 0 : i32
    %c0_i32_0 = arith.constant 0 : i32
    %c0_i32_1 = arith.constant 0 : i32
    return %c0_i32, %c0_i32_0 : i32, i32
  }
  func.func @transform_8(%arg0: i32) -> (i32, i32) {
    %c0_i32 = arith.constant 0 : i32
    %c0_i32_0 = arith.constant 0 : i32
    %c0_i32_1 = arith.constant 0 : i32
    return %c0_i32, %c0_i32_0 : i32, i32
  }
  func.func @transform_9(%arg0: i32) -> (i32, i32) {
    %c0_i32 = arith.constant 0 : i32
    %c0_i32_0 = arith.constant 0 : i32
    return %arg0, %c0_i32 : i32, i32
  }
}

</mosaic_0001>

<bundles_post_ra>
// kernel: _ranknet_forward_impl.1
= control target key start
LH: loop header
LB: loop body
LE: loop exit
PB: predicated region body
PF: predicated region fallthrough
CT: control target
= control target key end

     0   :  { %vm62_vm0 = vcmask 130048   ;;  %vm534_vm1 = vcmask 31744   ;;  %s861_s1 = inlined_call_operand.vmem [shape: bf16[16,128], index: 1, kind: input, shape index: {}]   ;;  %s862_s0 = inlined_call_operand.vmem [shape: bf16[2,16,16], index: 0, kind: input, shape index: {}]   ;;  %s863_s3 = inlined_call_operand.vmem [shape: bf16[128,128], index: 3, kind: input, shape index: {}]   ;;  %s864_s5 = inlined_call_operand.vmem [shape: bf16[128,128], index: 5, kind: input, shape index: {}]   ;;  %s865_s2 = inlined_call_operand.vmem [shape: f32[1,128], index: 2, kind: input, shape index: {}]   ;;  %s866_s7 = inlined_call_operand.vmem [shape: bf16[128,4], index: 7, kind: input, shape index: {}]   ;;  %s867_s4 = inlined_call_operand.vmem [shape: f32[1,128], index: 4, kind: input, shape index: {}]   ;;  %s868_s6 = inlined_call_operand.vmem [shape: f32[1,128], index: 6, kind: input, shape index: {}]   ;;  %s869_s8 = inlined_call_operand.vmem [shape: f32[1,4], index: 8, kind: input, shape index: {}]   ;;  %s870_s9 = inlined_call_operand.vmem [shape: f32[16,4], index: 9, kind: output, shape index: {}]  }
   0x1   :  { %v673_v0 = vld [vmem:[%s861_s1] sm:$0xff]   ;;  %v675_v2 = vld [vmem:[%s862_s0 + $0x8] sm:$0xff]   ;;  %v678_v5 = vld [vmem:[%s863_s3 + $0x10] sm:$0xff]  }
   0x2   :  { %v674_v1 = vld [vmem:[%s862_s0] sm:$0xff]   ;;  %607 = vmatprep.subr.bf16.mxu0 %v673_v0  ;;  %v677_v4 = vld [vmem:[%s863_s3 + $0x8] sm:$0xff]   ;;  %v679_v6 = vld [vmem:[%s863_s3 + $0x18] sm:$0xff]  }
   0x3   :  { %608 = vmatpush3.bf16.msra.mxu0 %v673_v0  ;;  %609 = vmatprep.mubr.msk.bf16.mxu0 %vm62_vm0, %v674_v1  ;;  %v676_v3 = vld [vmem:[%s863_s3] sm:$0xff]   ;;  %v681_v8 = vld [vmem:[%s863_s3 + $0x28] sm:$0xff]   ;;  %v682_v9 = vld [vmem:[%s863_s3 + $0x30] sm:$0xff]  }
   0x4   :  { %613 = vmatprep.subr.bf16.mxu1 %v676_v3  ;;  %v680_v7 = vld [vmem:[%s863_s3 + $0x20] sm:$0xff]   ;;  %v683_v10 = vld [vmem:[%s863_s3 + $0x38] sm:$0xff]   ;;  %v685_v12 = vld [vmem:[%s864_s5 + $0x8] sm:$0xff]  }
   0x5   :  { %614 = vmatpush3.bf16.msra.mxu1 %v676_v3  ;;  %v684_v11 = vld [vmem:[%s864_s5] sm:$0xff]   ;;  %v686_v13 = vld [vmem:[%s864_s5 + $0x10] sm:$0xff]   ;;  %v687_v14 = vld [vmem:[%s864_s5 + $0x18] sm:$0xff]  }
   0x6   :  { %610 = vmatmul.mubr.msk.bf16.vlgmr.msra.gmra.mrb[0].mxu0 %vm62_vm0, %v675_v2  ;;  %615 = vmatprep.subr.bf16.mxu1 %v677_v4  ;;  %v688_v15 = vld [vmem:[%s864_s5 + $0x20] sm:$0xff]   ;;  %v689_v35 = vld [vmem:[%s864_s5 + $0x28] sm:$0xff]   ;;  %v690_v36 = vld [vmem:[%s864_s5 + $0x30] sm:$0xff]  }
   0x7   :  { %633 = vmatprep.subr.bf16.mxu0 %v684_v11  ;;  %v541_v16 = vld [vmem:[%s865_s2] ss:$0 sm:$0xff]  ;;  %v691_v37 = vld [vmem:[%s864_s5 + $0x38] sm:$0xff]   ;;  %v693_v39 = vld [vmem:[%s866_s7 + $0x8] sm:$0xff]  }
   0x8   :  { %634 = vmatpush3.bf16.msra.mxu0 %v684_v11  ;;  %v692_v38 = vld [vmem:[%s866_s7] sm:$0xff]   ;;  %v694_v40 = vld [vmem:[%s866_s7 + $0x10] sm:$0xff]   ;;  %v695_v41 = vld [vmem:[%s866_s7 + $0x18] sm:$0xff]  }
   0x9   :  { %616 = vmatpush3.bf16.msra.mxu1 %v677_v4  ;;  %635 = vmatprep.subr.bf16.mxu0 %v685_v12  ;;  %v696_v42 = vld [vmem:[%s866_s7 + $0x20] sm:$0xff]   ;;  %v697_v62 = vld [vmem:[%s866_s7 + $0x28] sm:$0xff]   ;;  %v698_v63 = vld [vmem:[%s866_s7 + $0x30] sm:$0xff]  }
   0xa   :  { %617 = vmatprep.subr.bf16.mxu1 %v678_v5  ;;  %v547_v43 = vld [vmem:[%s867_s4] ss:$0 sm:$0xff]  ;;  %v699_v0 = vld [vmem:[%s866_s7 + $0x38] sm:$0xff]  }
   0xb   :  { %v556_v1 = vld [vmem:[%s868_s6] ss:$0 sm:$0xff] }
   0xc   :  { %636 = vmatpush3.bf16.msra.mxu0 %v685_v12 }
   0xd   :  { %618 = vmatpush3.bf16.msra.mxu1 %v678_v5  ;;  %637 = vmatprep.subr.bf16.mxu0 %v686_v13 }
   0xe   :  { %619 = vmatprep.subr.bf16.mxu1 %v679_v6 }
  0x10   :  { %638 = vmatpush3.bf16.msra.mxu0 %v686_v13 }
  0x11   :  { %620 = vmatpush3.bf16.msra.mxu1 %v679_v6  ;;  %639 = vmatprep.subr.bf16.mxu0 %v687_v14 }
  0x12   :  { %621 = vmatprep.subr.bf16.mxu1 %v680_v7 }
  0x14   :  { %640 = vmatpush3.bf16.msra.mxu0 %v687_v14 }
  0x15   :  { %622 = vmatpush3.bf16.msra.mxu1 %v680_v7  ;;  %641 = vmatprep.subr.bf16.mxu0 %v688_v15 }
  0x16   :  { %623 = vmatprep.subr.bf16.mxu1 %v681_v8 }
  0x18   :  { %642 = vmatpush3.bf16.msra.mxu0 %v688_v15 }
  0x19   :  { %624 = vmatpush3.bf16.msra.mxu1 %v681_v8  ;;  %643 = vmatprep.subr.bf16.mxu0 %v689_v35 }
  0x1a   :  { %625 = vmatprep.subr.bf16.mxu1 %v682_v9 }
  0x1c   :  { %644 = vmatpush3.bf16.msra.mxu0 %v689_v35 }
  0x1d   :  { %626 = vmatpush3.bf16.msra.mxu1 %v682_v9  ;;  %645 = vmatprep.subr.bf16.mxu0 %v690_v36 }
  0x1e   :  { %627 = vmatprep.subr.bf16.mxu1 %v683_v10 }
  0x20   :  { %646 = vmatpush3.bf16.msra.mxu0 %v690_v36 }
  0x21   :  { %628 = vmatpush3.bf16.msra.mxu1 %v683_v10  ;;  %647 = vmatprep.subr.bf16.mxu0 %v691_v37 }
  0x22   :  { %653 = vmatprep.subr.bf16.mxu1 %v692_v38 }
  0x24   :  { %648 = vmatpush3.bf16.msra.mxu0 %v691_v37 }
  0xd9   :  { %v611_v17 = vpop.f32.mrb[0].mxu0 }
  0xda   :  { %v112_v18 = vadd.f32 %v611_v17, %v541_v16  ;;  %v103_v19 = vpop.f32.mrb[1].mxu0 }
  0xdb   :  { %v104_v20 = vadd.f32 %v541_v16, %v103_v19  ;;  %v612_v21 = vpop.f32.mrb[2].mxu0 }
  0xdc   :  { %v120_v22 = vmul.f32 0.2, %v112_v18  ;;  %v115_v23 = vadd.f32 %v612_v21, %v541_v16  ;;  %v106_v24 = vpop.f32.mrb[3].mxu0 }
  0xdd   :  { %v118_v25 = vmul.f32 0.2, %v104_v20  ;;  %v107_v26 = vadd.f32 %v541_v16, %v106_v24 }
  0xde   :  { %v121_v27 = vmul.f32 0.2, %v115_v23  ;;  %v124_v29 = vmax.f32 %v112_v18, %v120_v22 }
  0xdf   :  { %v119_v28 = vmul.f32 0.2, %v107_v26  ;;  %v122_v31 = vmax.f32 %v104_v20, %v118_v25  ;;  %v565_v20 = vld [vmem:[%s869_s8] ss:$0 sm:$0xff] }
  0xe0   :  { %v125_v30 = vmax.f32 %v115_v23, %v121_v27 }
  0xe1   :  { %v123_v32 = vmax.f32 %v107_v26, %v119_v28 }
  0xe2   :  { %v127_v33 = vpack.c.bf16 %v125_v30, %v124_v29 }
  0xe3   :  { %v126_v34 = vpack.c.bf16 %v123_v32, %v122_v31 }
  0xe5   :  { %629 = vmatprep.mubr.bf16.mxu1 %v126_v34 }
  0xe6   :  { %630 = vmatmul.mubr.bf16.vlgmr.msra.gmra.mrb[0].mxu1 %v127_v33 }
  0xe7   :  { %654 = vmatpush3.bf16.msra.mxu1 %v692_v38 }
  0xe8   :  { %655 = vmatprep.subr.bf16.mxu1 %v693_v39 }
  0xeb   :  { %656 = vmatpush3.bf16.msra.mxu1 %v693_v39 }
  0xec   :  { %657 = vmatprep.subr.bf16.mxu1 %v694_v40 }
  0xef   :  { %658 = vmatpush3.bf16.msra.mxu1 %v694_v40 }
  0xf0   :  { %659 = vmatprep.subr.bf16.mxu1 %v695_v41 }
  0xf3   :  { %660 = vmatpush3.bf16.msra.mxu1 %v695_v41 }
  0xf4   :  { %661 = vmatprep.subr.bf16.mxu1 %v696_v42 }
  0xf7   :  { %662 = vmatpush3.bf16.msra.mxu1 %v696_v42 }
  0xf8   :  { %663 = vmatprep.subr.bf16.mxu1 %v697_v62 }
  0xfb   :  { %664 = vmatpush3.bf16.msra.mxu1 %v697_v62 }
  0xfc   :  { %665 = vmatprep.subr.bf16.mxu1 %v698_v63 }
  0xff   :  { %666 = vmatpush3.bf16.msra.mxu1 %v698_v63 }
 0x100   :  { %667 = vmatprep.subr.bf16.mxu1 %v699_v0 }
 0x103   :  { %668 = vmatpush3.bf16.msra.mxu1 %v699_v0 }
 0x1b9   :  { %v631_v44 = vpop.f32.mrb[0].mxu1 }
 0x1ba   :  { %v242_v45 = vadd.f32 %v631_v44, %v547_v43  ;;  %v233_v46 = vpop.f32.mrb[1].mxu1 }
 0x1bb   :  { %v234_v47 = vadd.f32 %v547_v43, %v233_v46  ;;  %v632_v48 = vpop.f32.mrb[2].mxu1 }
 0x1bc   :  { %v250_v49 = vmul.f32 0.2, %v242_v45  ;;  %v245_v50 = vadd.f32 %v632_v48, %v547_v43  ;;  %v236_v51 = vpop.f32.mrb[3].mxu1 }
 0x1bd   :  { %v248_v52 = vmul.f32 0.2, %v234_v47  ;;  %v237_v53 = vadd.f32 %v547_v43, %v236_v51 }
 0x1be   :  { %v251_v54 = vmul.f32 0.2, %v245_v50  ;;  %v254_v56 = vmax.f32 %v242_v45, %v250_v49 }
 0x1bf   :  { %v249_v55 = vmul.f32 0.2, %v237_v53  ;;  %v252_v58 = vmax.f32 %v234_v47, %v248_v52 }
 0x1c0   :  { %v255_v57 = vmax.f32 %v245_v50, %v251_v54 }
 0x1c1   :  { %v253_v59 = vmax.f32 %v237_v53, %v249_v55 }
 0x1c2   :  { %v257_v60 = vpack.c.bf16 %v255_v57, %v254_v56 }
 0x1c3   :  { %v256_v61 = vpack.c.bf16 %v253_v59, %v252_v58 }
 0x1c5   :  { %649 = vmatprep.mubr.bf16.mxu0 %v256_v61 }
 0x1c6   :  { %650 = vmatmul.mubr.bf16.vlgmr.msra.gmra.mrb[4].mxu0 %v257_v60 }
 0x299   :  { %v651_v2 = vpop.f32.mrb[4].mxu0 }
 0x29a   :  { %v372_v3 = vadd.f32 %v651_v2, %v556_v1  ;;  %v363_v4 = vpop.f32.mrb[5].mxu0 }
 0x29b   :  { %v364_v5 = vadd.f32 %v556_v1, %v363_v4  ;;  %v652_v6 = vpop.f32.mrb[6].mxu0 }
 0x29c   :  { %v380_v7 = vmul.f32 0.2, %v372_v3  ;;  %v375_v8 = vadd.f32 %v652_v6, %v556_v1  ;;  %v366_v9 = vpop.f32.mrb[7].mxu0 }
 0x29d   :  { %v378_v10 = vmul.f32 0.2, %v364_v5  ;;  %v367_v11 = vadd.f32 %v556_v1, %v366_v9 }
 0x29e   :  { %v381_v12 = vmul.f32 0.2, %v375_v8  ;;  %v384_v14 = vmax.f32 %v372_v3, %v380_v7 }
 0x29f   :  { %v379_v13 = vmul.f32 0.2, %v367_v11  ;;  %v382_v16 = vmax.f32 %v364_v5, %v378_v10 }
 0x2a0   :  { %v385_v15 = vmax.f32 %v375_v8, %v381_v12 }
 0x2a1   :  { %v383_v17 = vmax.f32 %v367_v11, %v379_v13 }
 0x2a2   :  { %v387_v18 = vpack.c.bf16 %v385_v15, %v384_v14 }
 0x2a3   :  { %v386_v19 = vpack.c.bf16 %v383_v17, %v382_v16 }
 0x2a5   :  { %669 = vmatprep.mubr.bf16.mxu1 %v386_v19 }
 0x2a6   :  { %670 = vmatmul.mubr.bf16.vlgmr.msra.gmra.mrb[4].mxu1 %v387_v18 }
 0x379   :  { %v671_v21 = vpop.f32.mrb[4].mxu1 }
 0x37a   :  { %v502_v22 = vadd.f32 %v671_v21, %v565_v20  ;;  %v493_v23 = vpop.f32.mrb[5].mxu1 }
 0x37b   :  { %v494_v24 = vadd.f32 %v565_v20, %v493_v23  ;;  %v672_v25 = vpop.f32.mrb[6].mxu1 }
 0x37c   :  { %v510_v26 = vmul.f32 0.5, %v502_v22  ;;  %v505_v27 = vadd.f32 %v672_v25, %v565_v20  ;;  %v496_v28 = vpop.f32.mrb[7].mxu1 }
 0x37d   :  { %v508_v29 = vmul.f32 0.5, %v494_v24  ;;  %v497_v30 = vadd.f32 %v565_v20, %v496_v28 }
 0x37e   :  { %700 = vtanh.f32 %v510_v26  ;;  %v511_v31 = vmul.f32 0.5, %v505_v27 }
 0x37f   :  { %702 = vtanh.f32 %v508_v29  ;;  %v509_v32 = vmul.f32 0.5, %v497_v30 }
 0x380   :  { %704 = vtanh.f32 %v511_v31 }
 0x381   :  { %706 = vtanh.f32 %v509_v32 }
 0x388   :  { %v701_v33 = vpop.eup %700 }
 0x389   :  { %v703_v34 = vpop.eup %702  ;;  %v518_v35 = vadd.f32 1.0, %v701_v33 }
 0x38a   :  { %v705_v36 = vpop.eup %704  ;;  %v516_v37 = vadd.f32 1.0, %v703_v34 }
 0x38b   :  { %v707_v38 = vpop.eup %706  ;;  %v522_v39 = vmul.f32 0.5, %v518_v35  ;;  %v519_v40 = vadd.f32 1.0, %v705_v36 }
 0x38c   :  { %v520_v41 = vmul.f32 0.5, %v516_v37  ;;  %v517_v42 = vadd.f32 1.0, %v707_v38 }
 0x38d   :  { %v523_v43 = vmul.f32 0.5, %v519_v40 }
 0x38e   :  { %v524_v44 = vsub.f32 %v520_v41, %v522_v39  ;;  %v521_v45 = vmul.f32 0.5, %v517_v42 }
 0x390   :  { %v526_v46 = vmul.f32 0.5, %v524_v44  ;;  %v525_v47 = vsub.f32 %v521_v45, %v523_v43 }
 0x392   :  { %708 = vtanh.f32 %v526_v46  ;;  %v527_v48 = vmul.f32 0.5, %v525_v47 }
 0x394   :  { %710 = vtanh.f32 %v527_v48 }
 0x39c   :  { %v709_v49 = vpop.eup %708 }
 0x39d   :  { %v530_v50 = vadd.f32 1.0, %v709_v49 }
 0x39e   :  { %v711_v51 = vpop.eup %710 }
 0x39f   :  { %v532_v52 = vmul.f32 0.5, %v530_v50  ;;  %v531_v53 = vadd.f32 1.0, %v711_v51 }
 0x3a1   :  { %535 = vst.msk [vmem:[%s870_s9] sm:$0xff] %vm534_vm1, %v532_v52  ;;  %v533_v54 = vmul.f32 0.5, %v531_v53 }
 0x3a3   :  { %536 = vst.msk [vmem:[%s870_s9 + $0x8] sm:$0xff] %vm534_vm1, %v533_v54 }

</bundles_post_ra>
